<compile_context>
chip_gen: v7x
topology: tpu7x:2x2x1
jax: 0.10.0
libtpu: 0.0.40
codegen_flags: <defaults>
</compile_context>

<pallas_src>
import functools

import jax
import jax.numpy as jnp
from jax import lax
from jax.experimental import pallas as pl
from jax.experimental.pallas import tpu as pltpu


def _round_up(x, m):
    return (x + m - 1) // m * m


# ---------------------------------------------------------------------------
# Kernel 1: fused GRUCell + ReLU over a (tm, Fp) row tile.
# ---------------------------------------------------------------------------
def _gru_relu_kernel(x_ref, h_ref, wrz_ref, win_ref, whn_ref,
                     brz_ref, bin_ref, bhn_ref, new_ref, act_ref, *, fp):
    """x_ref/h_ref: (tm, fp) f32.  wrz_ref: (2fp, 2fp), win/whn: (fp, fp) in the
    matmul dtype (bf16 default).  Biases are f32.  Outputs: h' and relu(h')."""
    x = x_ref[...]
    h = h_ref[...]

    mdt = wrz_ref.dtype                  # matmul operand dtype (bf16 or f32)
    xc = x.astype(mdt)
    hc = h.astype(mdt)

    # Fused r/z pre-activations: one MXU push with K = 2*fp.
    xh = jnp.concatenate([xc, hc], axis=1)                      # (tm, 2*fp)
    rz = jnp.dot(xh, wrz_ref[...],
                 preferred_element_type=jnp.float32) + brz_ref[...]
    rz = jax.nn.sigmoid(rz)
    r = rz[:, :fp]                       # lane-aligned slices (fp % 128 == 0)
    z = rz[:, fp:]

    # n gate: hidden-side term kept separate so r can scale it.
    i_n = jnp.dot(xc, win_ref[...],
                  preferred_element_type=jnp.float32) + bin_ref[...]
    h_n = jnp.dot(hc, whn_ref[...],
                  preferred_element_type=jnp.float32) + bhn_ref[...]
    n = jnp.tanh(i_n + r * h_n)

    new_h = n + z * (h - n)              # == (1 - z)*n + z*h, one VALU op fewer
    new_ref[...] = new_h.astype(new_ref.dtype)
    act_ref[...] = jnp.maximum(new_h, 0.0).astype(act_ref.dtype)


# ---------------------------------------------------------------------------
# Kernel 2: row gather.  Activated rows are VMEM-resident; neighbor indices are
# scalar-prefetched into SMEM; each grid step emits `rows_per_step` rows.
# ---------------------------------------------------------------------------
def _gather_rows_kernel(idx_ref, act_ref, out_ref, *, rows_per_step):
    base = pl.program_id(0) * rows_per_step

    def body(j, carry):
        src = idx_ref[base + j]
        out_ref[pl.ds(j, 1), :] = act_ref[pl.ds(src, 1), :]
        return carry

    lax.fori_loop(0, rows_per_step, body, 0)


def _prep_params(params, F, Fp, matmul_dtype):
    """Lane-padded, gate-fused weight/bias blocks (PyTorch gate order [r,z,n]).
    Weights are cast to `matmul_dtype` (bf16 default); biases stay f32."""
    w_ih = params["weight_ih"].astype(jnp.float32)   # (3F, F)
    w_hh = params["weight_hh"].astype(jnp.float32)   # (3F, F)
    b_ih = params["bias_ih"].astype(jnp.float32)     # (3F,)
    b_hh = params["bias_hh"].astype(jnp.float32)     # (3F,)

    def pad_w(w):  # (F, F) -> (Fp, Fp), zero padding
        return jnp.pad(w, ((0, Fp - F), (0, Fp - F)))

    def pad_b(b):  # (F,) -> (1, Fp)
        return jnp.pad(b, (0, Fp - F)).reshape(1, Fp)

    wih_r, wih_z, wih_n = w_ih[:F].T, w_ih[F:2 * F].T, w_ih[2 * F:].T
    whh_r, whh_z, whh_n = w_hh[:F].T, w_hh[F:2 * F].T, w_hh[2 * F:].T

    # Fused r/z weights: [x | h] @ W_rz gives [r_pre | z_pre] directly.
    w_rz = jnp.block([[pad_w(wih_r), pad_w(wih_z)],
                      [pad_w(whh_r), pad_w(whh_z)]]).astype(matmul_dtype)
    b_rz = jnp.concatenate([pad_b(b_ih[:F] + b_hh[:F]),
                            pad_b(b_ih[F:2 * F] + b_hh[F:2 * F])], axis=1)

    w_in = pad_w(wih_n).astype(matmul_dtype)
    w_hn = pad_w(whh_n).astype(matmul_dtype)
    b_in = pad_b(b_ih[2 * F:])
    b_hn = pad_b(b_hh[2 * F:])
    return w_rz, w_in, w_hn, b_rz, b_in, b_hn


def fp_transer_forward(atom_FP, context_FP, atom_neighbor_list, params,
                       *, matmul_dtype=jnp.bfloat16):
    """Pallas implementation of FPTranser.forward.

    Returns (new_atom_FP, activated_new_atom_FP, new_neighbor_FP)."""
    B, A, F = atom_FP.shape
    N = atom_neighbor_list.shape[-1]
    M = B * A
    out_dtype = atom_FP.dtype

    # Lane padding: F -> multiple of 128 (unmasked stores, aligned gate slices).
    Fp = _round_up(F, 128)

    # Row tile: big enough to amortize per-grid-step overhead (~0.35 us) and
    # keep the DMA pipeline full; capped so per-step VMEM stays modest and, when
    # there is enough work, the grid has >= 2 steps so both v7x TCs are used.
    bytes_per_row = 4 * Fp * 4                        # x, h, new, act (f32) per row
    tm_cap = max(256, min(1024, (8 * 1024 * 1024) // bytes_per_row // 8 * 8))
    m_aligned = _round_up(M, 8)
    if m_aligned <= tm_cap:
        tm = m_aligned
    else:
        tm = min(tm_cap, _round_up(pl.cdiv(m_aligned, 2), 8))
    Mp = _round_up(M, tm)
    grid = (Mp // tm,)

    x = context_FP.reshape(M, F)
    h = atom_FP.reshape(M, F)
    if (Mp, Fp) != (M, F):
        # TODO(synk): keep the (Mp, Fp) padded layout across the surrounding
        # model to avoid these framing pad/unpad copies when F % 128 != 0.
        x = jnp.pad(x, ((0, Mp - M), (0, Fp - F)))
        h = jnp.pad(h, ((0, Mp - M), (0, Fp - F)))

    w_rz, w_in, w_hn, b_rz, b_in, b_hn = _prep_params(params, F, Fp, matmul_dtype)

    kernel = functools.partial(_gru_relu_kernel, fp=Fp)

    new_flat, act_flat = pl.pallas_call(
        kernel,
        out_shape=(jax.ShapeDtypeStruct((Mp, Fp), out_dtype),
                   jax.ShapeDtypeStruct((Mp, Fp), out_dtype)),
        grid_spec=pltpu.PrefetchScalarGridSpec(
            num_scalar_prefetch=0,
            grid=grid,
            in_specs=[
                pl.BlockSpec((tm, Fp), lambda i: (i, 0)),           # x rows
                pl.BlockSpec((tm, Fp), lambda i: (i, 0)),           # h rows
                pl.BlockSpec((2 * Fp, 2 * Fp), lambda i: (0, 0)),   # fused r/z W
                pl.BlockSpec((Fp, Fp), lambda i: (0, 0)),           # Wih_n^T
                pl.BlockSpec((Fp, Fp), lambda i: (0, 0)),           # Whh_n^T
                pl.BlockSpec((1, 2 * Fp), lambda i: (0, 0)),        # b_rz (folded)
                pl.BlockSpec((1, Fp), lambda i: (0, 0)),            # b_ih_n
                pl.BlockSpec((1, Fp), lambda i: (0, 0)),            # b_hh_n
            ],
            out_specs=[
                pl.BlockSpec((tm, Fp), lambda i: (i, 0)),
                pl.BlockSpec((tm, Fp), lambda i: (i, 0)),
            ],
        ),
        compiler_params=pltpu.CompilerParams(
            dimension_semantics=("parallel",),
            vmem_limit_bytes=48 * 1024 * 1024),       # safe on v7x (64 MiB VMEM)
    )(x, h, w_rz, w_in, w_hn, b_rz, b_in, b_hn)

    new_atom_FP = new_flat[:M, :F].reshape(B, A, F)
    activated_new_atom_FP = act_flat[:M, :F].reshape(B, A, F)

    # ---- neighbour gather ---------------------------------------------------
    R = B * A * N
    rows_per_step = min(256, _round_up(R, 8))
    Rp = _round_up(R, rows_per_step)

    act_vmem_bytes = 2 * Mp * Fp * jnp.dtype(out_dtype).itemsize   # double-buffered
    if act_vmem_bytes > 24 * 1024 * 1024 or Rp > 32768:
        # TODO(synk): for very large graphs, replace with a manual-DMA gather
        # (memory_space=pl.ANY source + per-row async copies); the VMEM-resident
        # kernel below requires the activated table to fit on-chip.
        new_neighbor_FP = jax.vmap(lambda a, nl: a[nl])(activated_new_atom_FP,
                                                        atom_neighbor_list)
    else:
        global_idx = (atom_neighbor_list.astype(jnp.int32)
                      + (jnp.arange(B, dtype=jnp.int32) * A)[:, None, None])
        idx_flat = jnp.pad(global_idx.reshape(R), (0, Rp - R))

        gather_kernel = functools.partial(_gather_rows_kernel,
                                          rows_per_step=rows_per_step)
        nb_flat = pl.pallas_call(
            gather_kernel,
            out_shape=jax.ShapeDtypeStruct((Rp, Fp), out_dtype),
            grid_spec=pltpu.PrefetchScalarGridSpec(
                num_scalar_prefetch=1,
                grid=(Rp // rows_per_step,),
                in_specs=[pl.BlockSpec((Mp, Fp), lambda i, idx: (0, 0))],
                out_specs=pl.BlockSpec((rows_per_step, Fp),
                                       lambda i, idx: (i, 0)),
            ),
            compiler_params=pltpu.CompilerParams(
                dimension_semantics=("arbitrary",),
                vmem_limit_bytes=48 * 1024 * 1024),
        )(idx_flat, act_flat)
        new_neighbor_FP = nb_flat[:R, :F].reshape(B, A, N, F)

    return new_atom_FP, activated_new_atom_FP, new_neighbor_FP


def init_gru_params(key, fp_size, dtype=jnp.float32):
    """Deterministic GRUCell params, matching PyTorch shapes / init range."""
    k1, k2, k3, k4 = jax.random.split(key, 4)
    bound = 1.0 / (fp_size ** 0.5)
    u = lambda k, shape: jax.random.uniform(k, shape, dtype, -bound, bound)
    return {
        "weight_ih": u(k1, (3 * fp_size, fp_size)),
        "weight_hh": u(k2, (3 * fp_size, fp_size)),
        "bias_ih": u(k3, (3 * fp_size,)),
        "bias_hh": u(k4, (3 * fp_size,)),
    }


def _reference_forward(atom_FP, context_FP, atom_neighbor_list, params):
    """Pure-JAX reference mirroring torch.nn.GRUCell semantics."""
    B, A, F = atom_FP.shape
    x = context_FP.reshape(B * A, F)
    h = atom_FP.reshape(B * A, F)
    gi = x @ params["weight_ih"].T + params["bias_ih"]
    gh = h @ params["weight_hh"].T + params["bias_hh"]
    i_r, i_z, i_n = gi[:, :F], gi[:, F:2 * F], gi[:, 2 * F:]
    h_r, h_z, h_n = gh[:, :F], gh[:, F:2 * F], gh[:, 2 * F:]
    r = jax.nn.sigmoid(i_r + h_r)
    z = jax.nn.sigmoid(i_z + h_z)
    n = jnp.tanh(i_n + r * h_n)
    new_h = ((1.0 - z) * n + z * h).reshape(B, A, F)
    act = jnp.maximum(new_h, 0.0)
    nb = jax.vmap(lambda a, nl: a[nl])(act, atom_neighbor_list)
    return new_h, act, nb


if __name__ == "__main__":
    B, A, F, N = 2, 8, 32, 4   # batch, max_atom_length, FP_size, num_neighbors

    key = jax.random.PRNGKey(0)
    k_p, k_a, k_c, k_n = jax.random.split(key, 4)

    params = init_gru_params(k_p, F)
    atom_FP = jax.random.normal(k_a, (B, A, F), jnp.float32)
    context_FP = jax.random.normal(k_c, (B, A, F), jnp.float32)
    atom_neighbor_list = jax.random.randint(k_n, (B, A, N), 0, A, jnp.int32)

    ref_new, ref_act, ref_nb = _reference_forward(
        atom_FP, context_FP, atom_neighbor_list, params)

    # f32 MXU operands: near-parity with the pure-JAX reference.
    new_f32, act_f32, nb_f32 = jax.block_until_ready(fp_transer_forward(
        atom_FP, context_FP, atom_neighbor_list, params,
        matmul_dtype=jnp.float32))
    assert new_f32.shape == (B, A, F)
    assert act_f32.shape == (B, A, F)
    assert nb_f32.shape == (B, A, N, F)
    assert jnp.allclose(new_f32, ref_new, atol=2e-3, rtol=2e-3)
    assert jnp.allclose(act_f32, ref_act, atol=2e-3, rtol=2e-3)
    assert jnp.allclose(nb_f32, ref_nb, atol=2e-3, rtol=2e-3)

    # bf16 MXU operands (default fast path): looser tolerance, same semantics.
    new_bf, act_bf, nb_bf = jax.block_until_ready(fp_transer_forward(
        atom_FP, context_FP, atom_neighbor_list, params))
    assert jnp.allclose(new_bf, ref_new, atol=5e-2, rtol=5e-2)
    assert jnp.allclose(act_bf, ref_act, atol=5e-2, rtol=5e-2)
    assert jnp.allclose(nb_bf, ref_nb, atol=5e-2, rtol=5e-2)

    print("KERNEL_OK")
</pallas_src>

<mosaic_0001>
module attributes {stable_mosaic.version = 11 : i64} {
  func.func @_gru_relu_kernel(%arg0: i32, %arg1: memref<16x128xf32, #tpu.memory_space<vmem>>, %arg2: memref<16x128xf32, #tpu.memory_space<vmem>>, %arg3: memref<256x256xf32, #tpu.memory_space<vmem>>, %arg4: memref<128x128xf32, #tpu.memory_space<vmem>>, %arg5: memref<128x128xf32, #tpu.memory_space<vmem>>, %arg6: memref<1x256xf32, #tpu.memory_space<vmem>>, %arg7: memref<1x128xf32, #tpu.memory_space<vmem>>, %arg8: memref<1x128xf32, #tpu.memory_space<vmem>>, %arg9: memref<16x128xf32, #tpu.memory_space<vmem>>, %arg10: memref<16x128xf32, #tpu.memory_space<vmem>>) attributes {dimension_semantics = [#tpu.dimension_semantics<parallel>], iteration_bounds = array<i64: 1>, scalar_prefetch = 0 : i64, scratch_operands = 0 : i64, tpu.core_type = #tpu.core_type<tc>, window_params = [{transform_indices = @transform_0, window_bounds = array<i64: 16, 128>}, {transform_indices = @transform_1, window_bounds = array<i64: 16, 128>}, {pipeline_mode = #tpu.pipeline_mode<synchronous>, transform_indices = @transform_2, window_bounds = array<i64: 256, 256>}, {pipeline_mode = #tpu.pipeline_mode<synchronous>, transform_indices = @transform_3, window_bounds = array<i64: 128, 128>}, {pipeline_mode = #tpu.pipeline_mode<synchronous>, transform_indices = @transform_4, window_bounds = array<i64: 128, 128>}, {pipeline_mode = #tpu.pipeline_mode<synchronous>, transform_indices = @transform_5, window_bounds = array<i64: 1, 256>}, {pipeline_mode = #tpu.pipeline_mode<synchronous>, transform_indices = @transform_6, window_bounds = array<i64: 1, 128>}, {pipeline_mode = #tpu.pipeline_mode<synchronous>, transform_indices = @transform_7, window_bounds = array<i64: 1, 128>}, {transform_indices = @transform_8, window_bounds = array<i64: 16, 128>}, {transform_indices = @transform_9, window_bounds = array<i64: 16, 128>}]} {
    %c0 = arith.constant 0 : index
    %c0_0 = arith.constant 0 : index
    %0 = vector.load %arg1[%c0, %c0_0] : memref<16x128xf32, #tpu.memory_space<vmem>>, vector<16x128xf32>
    %c0_1 = arith.constant 0 : index
    %c0_2 = arith.constant 0 : index
    %1 = vector.load %arg2[%c0_1, %c0_2] : memref<16x128xf32, #tpu.memory_space<vmem>>, vector<16x128xf32>
    %2 = tpu.concatenate %0, %1 in 1 : vector<16x128xf32>, vector<16x128xf32> -> vector<16x256xf32>
    %c0_3 = arith.constant 0 : index
    %c0_4 = arith.constant 0 : index
    %3 = vector.load %arg3[%c0_3, %c0_4] : memref<256x256xf32, #tpu.memory_space<vmem>>, vector<256x256xf32>
    %cst = arith.constant dense<0.000000e+00> : vector<16x256xf32>
    %4 = tpu.matmul %2, %3, %cst {dimension_numbers = #tpu.dot_dimension_numbers<[1], [0], [0], [1], [0, 0, 1, 1], [], []>} : vector<16x256xf32>, vector<256x256xf32>, vector<16x256xf32> -> vector<16x256xf32>
    %c0_5 = arith.constant 0 : index
    %c0_6 = arith.constant 0 : index
    %5 = vector.load %arg6[%c0_5, %c0_6] : memref<1x256xf32, #tpu.memory_space<vmem>>, vector<1x256xf32>
    %6 = vector.broadcast %5 : vector<1x256xf32> to vector<16x256xf32>
    %7 = arith.addf %4, %6 : vector<16x256xf32>
    %8 = arith.negf %7 : vector<16x256xf32>
    %9 = math.exp %8 : vector<16x256xf32>
    %cst_7 = arith.constant 1.000000e+00 : f32
    %10 = vector.broadcast %cst_7 : f32 to vector<16x256xf32>
    %11 = arith.addf %10, %9 : vector<16x256xf32>
    %12 = arith.divf %10, %11 : vector<16x256xf32>
    %13 = vector.extract_strided_slice %12 {offsets = [0, 0], sizes = [16, 128], strides = [1, 1]} : vector<16x256xf32> to vector<16x128xf32>
    %14 = vector.extract_strided_slice %12 {offsets = [0, 128], sizes = [16, 128], strides = [1, 1]} : vector<16x256xf32> to vector<16x128xf32>
    %c0_8 = arith.constant 0 : index
    %c0_9 = arith.constant 0 : index
    %15 = vector.load %arg4[%c0_8, %c0_9] : memref<128x128xf32, #tpu.memory_space<vmem>>, vector<128x128xf32>
    %cst_10 = arith.constant dense<0.000000e+00> : vector<16x128xf32>
    %16 = tpu.matmul %0, %15, %cst_10 {dimension_numbers = #tpu.dot_dimension_numbers<[1], [0], [0], [1], [0, 0, 1, 1], [], []>} : vector<16x128xf32>, vector<128x128xf32>, vector<16x128xf32> -> vector<16x128xf32>
    %c0_11 = arith.constant 0 : index
    %c0_12 = arith.constant 0 : index
    %17 = vector.load %arg7[%c0_11, %c0_12] : memref<1x128xf32, #tpu.memory_space<vmem>>, vector<1x128xf32>
    %18 = vector.broadcast %17 : vector<1x128xf32> to vector<16x128xf32>
    %19 = arith.addf %16, %18 : vector<16x128xf32>
    %c0_13 = arith.constant 0 : index
    %c0_14 = arith.constant 0 : index
    %20 = vector.load %arg5[%c0_13, %c0_14] : memref<128x128xf32, #tpu.memory_space<vmem>>, vector<128x128xf32>
    %cst_15 = arith.constant dense<0.000000e+00> : vector<16x128xf32>
    %21 = tpu.matmul %1, %20, %cst_15 {dimension_numbers = #tpu.dot_dimension_numbers<[1], [0], [0], [1], [0, 0, 1, 1], [], []>} : vector<16x128xf32>, vector<128x128xf32>, vector<16x128xf32> -> vector<16x128xf32>
    %c0_16 = arith.constant 0 : index
    %c0_17 = arith.constant 0 : index
    %22 = vector.load %arg8[%c0_16, %c0_17] : memref<1x128xf32, #tpu.memory_space<vmem>>, vector<1x128xf32>
    %23 = vector.broadcast %22 : vector<1x128xf32> to vector<16x128xf32>
    %24 = arith.addf %21, %23 : vector<16x128xf32>
    %25 = arith.mulf %13, %24 : vector<16x128xf32>
    %26 = arith.addf %19, %25 : vector<16x128xf32>
    %27 = math.tanh %26 : vector<16x128xf32>
    %28 = arith.subf %1, %27 : vector<16x128xf32>
    %29 = arith.mulf %14, %28 : vector<16x128xf32>
    %30 = arith.addf %27, %29 : vector<16x128xf32>
    %c0_18 = arith.constant 0 : index
    %c0_19 = arith.constant 0 : index
    %31 = vector.load %arg9[%c0_18, %c0_19] : memref<16x128xf32, #tpu.memory_space<vmem>>, vector<16x128xf32>
    tpu.vector_store %arg9[%c0_18, %c0_19], %30 {strides = array<i32>} : memref<16x128xf32, #tpu.memory_space<vmem>>, vector<16x128xf32>,
    %cst_20 = arith.constant 0.000000e+00 : f32
    %32 = vector.broadcast %cst_20 : f32 to vector<16x128xf32>
    %33 = arith.maximumf %30, %32 : vector<16x128xf32>
    %c0_21 = arith.constant 0 : index
    %c0_22 = arith.constant 0 : index
    %34 = vector.load %arg10[%c0_21, %c0_22] : memref<16x128xf32, #tpu.memory_space<vmem>>, vector<16x128xf32>
    tpu.vector_store %arg10[%c0_21, %c0_22], %33 {strides = array<i32>} : memref<16x128xf32, #tpu.memory_space<vmem>>, vector<16x128xf32>,
    return
  }
  func.func @transform_0(%arg0: i32) -> (i32, i32) {
    %c0_i32 = arith.constant 0 : i32
    %c0_i32_0 = arith.constant 0 : i32
    return %arg0, %c0_i32 : i32, i32
  }
  func.func @transform_1(%arg0: i32) -> (i32, i32) {
    %c0_i32 = arith.constant 0 : i32
    %c0_i32_0 = arith.constant 0 : i32
    return %arg0, %c0_i32 : i32, i32
  }
  func.func @transform_2(%arg0: i32) -> (i32, i32) {
    %c0_i32 = arith.constant 0 : i32
    %c0_i32_0 = arith.constant 0 : i32
    %c0_i32_1 = arith.constant 0 : i32
    return %c0_i32, %c0_i32_0 : i32, i32
  }
  func.func @transform_3(%arg0: i32) -> (i32, i32) {
    %c0_i32 = arith.constant 0 : i32
    %c0_i32_0 = arith.constant 0 : i32
    %c0_i32_1 = arith.constant 0 : i32
    return %c0_i32, %c0_i32_0 : i32, i32
  }
  func.func @transform_4(%arg0: i32) -> (i32, i32) {
    %c0_i32 = arith.constant 0 : i32
    %c0_i32_0 = arith.constant 0 : i32
    %c0_i32_1 = arith.constant 0 : i32
    return %c0_i32, %c0_i32_0 : i32, i32
  }
  func.func @transform_5(%arg0: i32) -> (i32, i32) {
    %c0_i32 = arith.constant 0 : i32
    %c0_i32_0 = arith.constant 0 : i32
    %c0_i32_1 = arith.constant 0 : i32
    return %c0_i32, %c0_i32_0 : i32, i32
  }
  func.func @transform_6(%arg0: i32) -> (i32, i32) {
    %c0_i32 = arith.constant 0 : i32
    %c0_i32_0 = arith.constant 0 : i32
    %c0_i32_1 = arith.constant 0 : i32
    return %c0_i32, %c0_i32_0 : i32, i32
  }
  func.func @transform_7(%arg0: i32) -> (i32, i32) {
    %c0_i32 = arith.constant 0 : i32
    %c0_i32_0 = arith.constant 0 : i32
    %c0_i32_1 = arith.constant 0 : i32
    return %c0_i32, %c0_i32_0 : i32, i32
  }
  func.func @transform_8(%arg0: i32) -> (i32, i32) {
    %c0_i32 = arith.constant 0 : i32
    %c0_i32_0 = arith.constant 0 : i32
    return %arg0, %c0_i32 : i32, i32
  }
  func.func @transform_9(%arg0: i32) -> (i32, i32) {
    %c0_i32 = arith.constant 0 : i32
    %c0_i32_0 = arith.constant 0 : i32
    return %arg0, %c0_i32 : i32, i32
  }
}

</mosaic_0001>

<bundles_post_ra>
// kernel: tpu_custom_call.1
= control target key start
LH: loop header
LB: loop body
LE: loop exit
PB: predicated region body
PF: predicated region fallthrough
CT: control target
= control target key end

     0   :  { %15 = vsyncpa [#allocation3], 0  ;;  %s1177_s0 = inlined_call_operand.hbm [shape: f32[16,128], index: 0, kind: input, shape index: {}]   ;;  %s1178_s1 = inlined_call_operand.hbm [shape: f32[16,128], index: 1, kind: input, shape index: {}]   ;;  %s1179_s2 = inlined_call_operand.hbm [shape: f32[256,256], index: 2, kind: input, shape index: {}]   ;;  %s1180_s3 = inlined_call_operand.hbm [shape: f32[128,128], index: 3, kind: input, shape index: {}]   ;;  %s1181_s4 = inlined_call_operand.hbm [shape: f32[128,128], index: 4, kind: input, shape index: {}]   ;;  %s1182_s5 = inlined_call_operand.vmem [shape: f32[1,256], index: 5, kind: input, shape index: {}]   ;;  %s1183_s6 = inlined_call_operand.vmem [shape: f32[1,128], index: 6, kind: input, shape index: {}]   ;;  %s1184_s7 = inlined_call_operand.vmem [shape: f32[1,128], index: 7, kind: input, shape index: {}]   ;;  %s1185_s8 = inlined_call_operand.hbm [shape: f32[16,128], index: 8, kind: output, shape index: {0}]   ;;  %s1186_s9 = inlined_call_operand.hbm [shape: f32[16,128], index: 9, kind: output, shape index: {1}]  }
   0x1   :  { %16 = vsyncpa [#allocation6], 0 }
   0x2   :  { %17 = vsyncpa [#allocation9], 0 }
   0x3   :  { %18 = vsyncpa [#allocation4], 0 }
   0x4   :  { %19 = vsyncpa [#allocation13], 0  ;;  %s966_s30 = smov [#allocation5]   ;;  %s967_s11 = smov [#allocation8]  }
   0x5   :  { %s37_s10 = sshll.u32 %s966_s30, 4  ;;  %s61_s12 = sshll.u32 %s967_s11, 4  ;;  %s38_s10 = int_to_ptr.vmem [resolvable:$true] %s37_s10  ;;  %s1027_s12 = int_to_ptr.vmem [resolvable:$true] %s61_s12 }
   0x6   :  { %s802_s15 = scalar_lea.hbm %s1178_s1, 256 }
   0x7   :  { %p803_p0 = scmp.ne.s32.totalorder %s1178_s1, %s802_s15  ;;  %p806_p1 = scmp.lt.u32.totalorder %s802_s15, %s1178_s1 }
   0x9   :  { %p808_p2 = pnand %p806_p1, %p803_p0 }
   0xb   :  { %811 = shalt.err (!%p808_p2)
}
   0xc   :  { %s812_s20 = scalar_lea.vmem %s38_s10, 256  ;;  %p817_p4 = scmp.lt.s32.totalorder %s38_s10, %s38_s10 }
   0xd   :  { %p813_p3 = scmp.ne.s32.totalorder %s38_s10, %s812_s20  ;;  %p818_p5 = scmp.lt.s32.totalorder %s812_s20, %s812_s20 }
   0xf   :  { %p819_p6 = por %p818_p5, %p817_p4 }
  0x11   :  { %p820_p7 = pnand %p819_p6, %p813_p3 }
  0x13   :  { %823 = shalt.err (!%p820_p7)
}
  0x14   :  { %s968_s21 = smov 128   ;;  %s969_s22 = smov 8  }
  0x15   :  { %43 = dma.hbm_to_vmem [thread:$0]  %s1178_s1, 256, %s38_s10, [#allocation6], %s968_s21, %s968_s21, %s969_s22  }
  0x16   :  { %s824_s27 = scalar_lea.hbm %s1180_s3, 2048 }
  0x17   :  { %p825_p8 = scmp.ne.s32.totalorder %s1180_s3, %s824_s27  ;;  %p828_p9 = scmp.lt.u32.totalorder %s824_s27, %s1180_s3 }
  0x19   :  { %p830_p10 = pnand %p828_p9, %p825_p8 }
  0x1b   :  { %833 = shalt.err (!%p830_p10)
}
  0x1c   :  { %s834_s13 = scalar_lea.vmem %s1027_s12, 2048  ;;  %p839_p12 = scmp.lt.s32.totalorder %s1027_s12, %s1027_s12 }
  0x1d   :  { %p835_p11 = scmp.ne.s32.totalorder %s1027_s12, %s834_s13  ;;  %p840_p13 = scmp.lt.s32.totalorder %s834_s13, %s834_s13 }
  0x1f   :  { %p841_p0 = por %p840_p13, %p839_p12 }
  0x21   :  { %p842_p1 = pnand %p841_p0, %p835_p11 }
  0x23   :  { %845 = shalt.err (!%p842_p1)
}
  0x24   :  { %67 = dma.hbm_to_vmem [thread:$0]  %s1180_s3, 2048, %s1027_s12, [#allocation9], %s968_s21, %s968_s21, %s969_s22  }
  0x25   :  { %s970_s14 = smov [#allocation2]   ;;  %s971_s16 = smov [#allocation7]  }
  0x26   :  { %s25_s15 = sshll.u32 %s970_s14, 4  ;;  %s49_s17 = sshll.u32 %s971_s16, 4  ;;  %s26_s15 = int_to_ptr.vmem [resolvable:$true] %s25_s15  ;;  %s1064_s17 = int_to_ptr.vmem [resolvable:$true] %s49_s17 }
  0x27   :  { %s846_s20 = scalar_lea.hbm %s1177_s0, 256 }
  0x28   :  { %p847_p2 = scmp.ne.s32.totalorder %s1177_s0, %s846_s20  ;;  %p850_p3 = scmp.lt.u32.totalorder %s846_s20, %s1177_s0 }
  0x2a   :  { %p852_p4 = pnand %p850_p3, %p847_p2 }
  0x2c   :  { %855 = shalt.err (!%p852_p4)
}
  0x2d   :  { %s856_s3 = scalar_lea.vmem %s26_s15, 256  ;;  %p861_p6 = scmp.lt.s32.totalorder %s26_s15, %s26_s15 }
  0x2e   :  { %p857_p5 = scmp.ne.s32.totalorder %s26_s15, %s856_s3  ;;  %p862_p7 = scmp.lt.s32.totalorder %s856_s3, %s856_s3 }
  0x30   :  { %p863_p8 = por %p862_p7, %p861_p6 }
  0x32   :  { %p864_p9 = pnand %p863_p8, %p857_p5 }
  0x34   :  { %867 = shalt.err (!%p864_p9)
}
  0x35   :  { %31 = dma.hbm_to_vmem [thread:$0]  %s1177_s0, 256, %s26_s15, [#allocation3], %s968_s21, %s968_s21, %s969_s22  }
  0x36   :  { %s868_s30 = scalar_lea.hbm %s1179_s2, 8192 }
  0x37   :  { %p869_p10 = scmp.ne.s32.totalorder %s1179_s2, %s868_s30  ;;  %p872_p11 = scmp.lt.u32.totalorder %s868_s30, %s1179_s2 }
  0x39   :  { %p874_p12 = pnand %p872_p11, %p869_p10 }
  0x3b   :  { %877 = shalt.err (!%p874_p12)
}
  0x3c   :  { %s878_s14 = scalar_lea.vmem %s1064_s17, 8192  ;;  %p883_p0 = scmp.lt.s32.totalorder %s1064_s17, %s1064_s17 }
  0x3d   :  { %p879_p13 = scmp.ne.s32.totalorder %s1064_s17, %s878_s14  ;;  %p884_p1 = scmp.lt.s32.totalorder %s878_s14, %s878_s14 }
  0x3f   :  { %p885_p2 = por %p884_p1, %p883_p0 }
  0x41   :  { %p886_p3 = pnand %p885_p2, %p879_p13 }
  0x43   :  { %889 = shalt.err (!%p886_p3)
}
  0x44   :  { %s972_s0 = smov 256   ;;  %s973_s15 = smov 16  }
  0x45   :  { %55 = dma.hbm_to_vmem [thread:$0]  %s1179_s2, 8192, %s1064_s17, [#allocation6], %s972_s0, %s972_s0, %s973_s15  }
  0x46   :  { %s974_s19 = smov [#allocation10]   ;;  %s890_s25 = scalar_lea.hbm %s1181_s4, 2048 }
  0x47   :  { %s73_s20 = sshll.u32 %s974_s19, 4  ;;  %p891_p4 = scmp.ne.s32.totalorder %s1181_s4, %s890_s25  ;;  %s74_s20 = int_to_ptr.vmem [resolvable:$true] %s73_s20 }
  0x48   :  { %p894_p5 = scmp.lt.u32.totalorder %s890_s25, %s1181_s4 }
  0x4a   :  { %p896_p6 = pnand %p894_p5, %p891_p4 }
  0x4c   :  { %899 = shalt.err (!%p896_p6)
}
  0x4d   :  { %s900_s28 = scalar_lea.vmem %s74_s20, 2048  ;;  %p905_p8 = scmp.lt.s32.totalorder %s74_s20, %s74_s20 }
  0x4e   :  { %p901_p7 = scmp.ne.s32.totalorder %s74_s20, %s900_s28  ;;  %p906_p9 = scmp.lt.s32.totalorder %s900_s28, %s900_s28 }
  0x50   :  { %p907_p10 = por %p906_p9, %p905_p8 }
  0x52   :  { %p908_p11 = pnand %p907_p10, %p901_p7 }
  0x54   :  { %911 = shalt.err (!%p908_p11)
}
  0x55   :  { %79 = dma.hbm_to_vmem [thread:$0]  %s1181_s4, 2048, %s74_s20, [#allocation9], %s968_s21, %s968_s21, %s969_s22  }
  0x56   :  { %956 = dma.done.wait [#allocation3], 256  }
  0x57   :  { %957 = vsyncadd [#allocation3], 4294967040 }
  0x58   :  { %958 = dma.done.wait [#allocation6], 8448  }
  0x59   :  { %959 = vsyncadd [#allocation6], 4294958848 }
  0x5a   :  { %960 = dma.done.wait [#allocation9], 4096  }
  0x5b   :  { %961 = vsyncadd [#allocation9], 4294963200  ;;  %v106_v0 = vld [vmem:[#allocation7 + $0x8] sm:$0xff]  ;;  %v108_v1 = vld [vmem:[#allocation7 + $0x18] sm:$0xff]  ;;  %s976_s1 = smov [#allocation12]  }
  0x5c   :  { %v105_v2 = vld [vmem:[#allocation7] sm:$0xff]  ;;  %v643_v3 = vpack.c.bf16 %v108_v1, %v106_v0  ;;  %v107_v4 = vld [vmem:[#allocation7 + $0x10] sm:$0xff]  ;;  %v110_v5 = vld [vmem:[#allocation7 + $0x28] sm:$0xff]  ;;  %s513_s10 = sshll.u32 %s976_s1, 4  ;;  %s1140_s10 = int_to_ptr.vmem [resolvable:$true] %s513_s10 }
  0x5d   :  { %v112_v6 = vld [vmem:[#allocation7 + $0x38] sm:$0xff]  ;;  %v645_v7 = vpack.c.bf16 %v107_v4, %v105_v2  ;;  %v109_v9 = vld [vmem:[#allocation7 + $0x20] sm:$0xff]  ;;  %v111_v10 = vld [vmem:[#allocation7 + $0x30] sm:$0xff] }
  0x5e   :  { %v647_v8 = vpack.c.bf16 %v112_v6, %v110_v5  ;;  %v114_v11 = vld [vmem:[#allocation7 + $0x48] sm:$0xff]  ;;  %644 = vmatprep.subr.bf16.mxu0 %v643_v3  ;;  %v116_v12 = vld [vmem:[#allocation7 + $0x58] sm:$0xff]  ;;  %v649_v13 = vpack.c.bf16 %v111_v10, %v109_v9  ;;  %v113_v15 = vld [vmem:[#allocation7 + $0x40] sm:$0xff] }
  0x5f   :  { %646 = vmatpush1.bf16.msra.mxu0 %v645_v7  ;;  %v651_v14 = vpack.c.bf16 %v116_v12, %v114_v11  ;;  %v115_v16 = vld [vmem:[#allocation7 + $0x50] sm:$0xff]  ;;  %v118_v17 = vld [vmem:[#allocation7 + $0x68] sm:$0xff]  ;;  %v120_v18 = vld [vmem:[#allocation7 + $0x78] sm:$0xff] }
  0x60   :  { %648 = vmatprep.subr.bf16.mxu0 %v647_v8  ;;  %v653_v19 = vpack.c.bf16 %v115_v16, %v113_v15  ;;  %v117_v20 = vld [vmem:[#allocation7 + $0x60] sm:$0xff]  ;;  %v655_v21 = vpack.c.bf16 %v120_v18, %v118_v17  ;;  %v119_v22 = vld [vmem:[#allocation7 + $0x70] sm:$0xff]  ;;  %v283_v24 = vld [vmem:[#allocation8 + $0x8] sm:$0xff] }
  0x61   :  { %v282_v23 = vld [vmem:[#allocation8] sm:$0xff]  ;;  %v122_v25 = vld [vmem:[#allocation7 + $0x88] sm:$0xff]  ;;  %v124_v26 = vld [vmem:[#allocation7 + $0x98] sm:$0xff]  ;;  %v657_v30 = vpack.c.bf16 %v119_v22, %v117_v20 }
  0x62   :  { %v707_v27 = vpack.c.bf16 %v283_v24, %v282_v23  ;;  %v284_v28 = vld [vmem:[#allocation8 + $0x10] sm:$0xff]  ;;  %v285_v29 = vld [vmem:[#allocation8 + $0x18] sm:$0xff]  ;;  %v121_v31 = vld [vmem:[#allocation7 + $0x80] sm:$0xff]  ;;  %v659_v33 = vpack.c.bf16 %v124_v26, %v122_v25 }
  0x63   :  { %650 = vmatpush1.bf16.msra.mxu0 %v649_v13  ;;  %v711_v32 = vpack.c.bf16 %v285_v29, %v284_v28  ;;  %v123_v34 = vld [vmem:[#allocation7 + $0x90] sm:$0xff]  ;;  %v286_v35 = vld [vmem:[#allocation8 + $0x20] sm:$0xff]  ;;  %v287_v36 = vld [vmem:[#allocation8 + $0x28] sm:$0xff] }
  0x64   :  { %652 = vmatprep.subr.bf16.mxu0 %v651_v14  ;;  %708 = vmatprep.subr.bf16.mxu1 %v707_v27  ;;  %v126_v37 = vld [vmem:[#allocation7 + $0xa8] sm:$0xff]  ;;  %v128_v38 = vld [vmem:[#allocation7 + $0xb8] sm:$0xff]  ;;  %v715_v39 = vpack.c.bf16 %v287_v36, %v286_v35  ;;  %v288_v40 = vld [vmem:[#allocation8 + $0x30] sm:$0xff]  ;;  %v661_v42 = vpack.c.bf16 %v123_v34, %v121_v31 }
  0x65   :  { %710 = vmatpush3.bf16.msra.mxu1 %v707_v27  ;;  %v289_v41 = vld [vmem:[#allocation8 + $0x38] sm:$0xff]  ;;  %v663_v43 = vpack.c.bf16 %v128_v38, %v126_v37  ;;  %v125_v44 = vld [vmem:[#allocation7 + $0xa0] sm:$0xff]  ;;  %v127_v45 = vld [vmem:[#allocation7 + $0xb0] sm:$0xff] }
  0x66   :  { %712 = vmatprep.subr.bf16.mxu1 %v711_v32  ;;  %v130_v46 = vld [vmem:[#allocation7 + $0xc8] sm:$0xff]  ;;  %v132_v47 = vld [vmem:[#allocation7 + $0xd8] sm:$0xff]  ;;  %v719_v48 = vpack.c.bf16 %v289_v41, %v288_v40  ;;  %v290_v49 = vld [vmem:[#allocation8 + $0x40] sm:$0xff]  ;;  %v665_v51 = vpack.c.bf16 %v127_v45, %v125_v44 }
  0x67   :  { %654 = vmatpush1.bf16.msra.mxu0 %v653_v19  ;;  %v291_v50 = vld [vmem:[#allocation8 + $0x48] sm:$0xff]  ;;  %v667_v52 = vpack.c.bf16 %v132_v47, %v130_v46  ;;  %v129_v53 = vld [vmem:[#allocation7 + $0xc0] sm:$0xff]  ;;  %v131_v54 = vld [vmem:[#allocation7 + $0xd0] sm:$0xff] }
  0x68   :  { %656 = vmatprep.subr.bf16.mxu0 %v655_v21  ;;  %v134_v55 = vld [vmem:[#allocation7 + $0xe8] sm:$0xff]  ;;  %v136_v56 = vld [vmem:[#allocation7 + $0xf8] sm:$0xff]  ;;  %v723_v57 = vpack.c.bf16 %v291_v50, %v290_v49  ;;  %v292_v58 = vld [vmem:[#allocation8 + $0x50] sm:$0xff]  ;;  %v669_v60 = vpack.c.bf16 %v131_v54, %v129_v53 }
  0x69   :  { %714 = vmatpush3.bf16.msra.mxu1 %v711_v32  ;;  %v293_v59 = vld [vmem:[#allocation8 + $0x58] sm:$0xff]  ;;  %v671_v61 = vpack.c.bf16 %v136_v56, %v134_v55  ;;  %v133_v62 = vld [vmem:[#allocation7 + $0xe0] sm:$0xff]  ;;  %v135_v63 = vld [vmem:[#allocation7 + $0xf0] sm:$0xff] }
  0x6a   :  { %716 = vmatprep.subr.bf16.mxu1 %v715_v39  ;;  %v1113_v0 = vld [vmem:[#allocation2] sm:$0xff]  ;;  %v138_v1 = vld [vmem:[#allocation7 + $0x108] sm:$0xff]  ;;  %v140_v2 = vld [vmem:[#allocation7 + $0x118] sm:$0xff]  ;;  %v727_v3 = vpack.c.bf16 %v293_v59, %v292_v58  ;;  %v673_v6 = vpack.c.bf16 %v135_v63, %v133_v62 }
  0x6b   :  { %658 = vmatpush1.bf16.msra.mxu0 %v657_v30  ;;  %605 = vmatprep.mubr.f32.mxu1 %v1113_v0  ;;  %v294_v4 = vld [vmem:[#allocation8 + $0x60] sm:$0xff]  ;;  %v295_v5 = vld [vmem:[#allocation8 + $0x68] sm:$0xff]  ;;  %v1116_v7 = vld [vmem:[#allocation5] sm:$0xff]  ;;  %v675_v8 = vpack.c.bf16 %v140_v2, %v138_v1 }
  0x6c   :  { %660 = vmatprep.subr.bf16.mxu0 %v659_v33  ;;  %v137_v9 = vld [vmem:[#allocation7 + $0x100] sm:$0xff]  ;;  %v139_v10 = vld [vmem:[#allocation7 + $0x110] sm:$0xff]  ;;  %v142_v11 = vld [vmem:[#allocation7 + $0x128] sm:$0xff]  ;;  %v731_v13 = vpack.c.bf16 %v295_v5, %v294_v4  ;;  %245 = vmatprep.mubr.f32.mxu0 %v1116_v7 }
  0x6d   :  { %718 = vmatpush3.bf16.msra.mxu1 %v715_v39  ;;  %v144_v12 = vld [vmem:[#allocation7 + $0x138] sm:$0xff]  ;;  %v296_v14 = vld [vmem:[#allocation8 + $0x70] sm:$0xff]  ;;  %v677_v16 = vpack.c.bf16 %v139_v10, %v137_v9  ;;  %v141_v18 = vld [vmem:[#allocation7 + $0x120] sm:$0xff] }
  0x6e   :  { %720 = vmatprep.subr.bf16.mxu1 %v719_v48  ;;  %v297_v15 = vld [vmem:[#allocation8 + $0x78] sm:$0xff]  ;;  %v679_v17 = vpack.c.bf16 %v144_v12, %v142_v11  ;;  %v143_v19 = vld [vmem:[#allocation7 + $0x130] sm:$0xff]  ;;  %v146_v20 = vld [vmem:[#allocation7 + $0x148] sm:$0xff] }
  0x6f   :  { %662 = vmatpush1.bf16.msra.mxu0 %v661_v42  ;;  %v148_v21 = vld [vmem:[#allocation7 + $0x158] sm:$0xff]  ;;  %v735_v22 = vpack.c.bf16 %v297_v15, %v296_v14  ;;  %v380_v23 = vld [vmem:[#allocation10] sm:$0xff]  ;;  %v381_v24 = vld [vmem:[#allocation10 + $0x8] sm:$0xff]  ;;  %v681_v25 = vpack.c.bf16 %v143_v19, %v141_v18 }
  0x70   :  { %664 = vmatprep.subr.bf16.mxu0 %v663_v43  ;;  %v683_v26 = vpack.c.bf16 %v148_v21, %v146_v20  ;;  %v145_v27 = vld [vmem:[#allocation7 + $0x140] sm:$0xff]  ;;  %v147_v28 = vld [vmem:[#allocation7 + $0x150] sm:$0xff]  ;;  %v150_v29 = vld [vmem:[#allocation7 + $0x168] sm:$0xff]  ;;  %v739_v31 = vpack.c.bf16 %v381_v24, %v380_v23  ;;  %v171_v24 = vlaneseq }
  0x71   :  { %722 = vmatpush3.bf16.msra.mxu1 %v719_v48  ;;  %v152_v30 = vld [vmem:[#allocation7 + $0x178] sm:$0xff]  ;;  %v382_v32 = vld [vmem:[#allocation10 + $0x10] sm:$0xff]  ;;  %v685_v34 = vpack.c.bf16 %v147_v28, %v145_v27  ;;  %v149_v36 = vld [vmem:[#allocation7 + $0x160] sm:$0xff] }
  0x72   :  { %724 = vmatprep.subr.bf16.mxu1 %v723_v57  ;;  %v383_v33 = vld [vmem:[#allocation10 + $0x18] sm:$0xff]  ;;  %v687_v35 = vpack.c.bf16 %v152_v30, %v150_v29  ;;  %v151_v37 = vld [vmem:[#allocation7 + $0x170] sm:$0xff]  ;;  %v1119_v38 = vld [vmem:[#allocation2 + $0x8] sm:$0xff] }
  0x73   :  { %666 = vmatpush1.bf16.msra.mxu0 %v665_v51  ;;  %v154_v39 = vld [vmem:[#allocation7 + $0x188] sm:$0xff]  ;;  %v156_v40 = vld [vmem:[#allocation7 + $0x198] sm:$0xff]  ;;  %v743_v41 = vpack.c.bf16 %v383_v33, %v382_v32  ;;  %v384_v42 = vld [vmem:[#allocation10 + $0x20] sm:$0xff]  ;;  %v689_v44 = vpack.c.bf16 %v151_v37, %v149_v36 }
  0x74   :  { %668 = vmatprep.subr.bf16.mxu0 %v667_v52  ;;  %v385_v43 = vld [vmem:[#allocation10 + $0x28] sm:$0xff]  ;;  %v691_v45 = vpack.c.bf16 %v156_v40, %v154_v39  ;;  %v153_v46 = vld [vmem:[#allocation7 + $0x180] sm:$0xff]  ;;  %v155_v47 = vld [vmem:[#allocation7 + $0x190] sm:$0xff] }
  0x75   :  { %726 = vmatpush3.bf16.msra.mxu1 %v723_v57  ;;  %v158_v48 = vld [vmem:[#allocation7 + $0x1a8] sm:$0xff]  ;;  %v160_v49 = vld [vmem:[#allocation7 + $0x1b8] sm:$0xff]  ;;  %v747_v50 = vpack.c.bf16 %v385_v43, %v384_v42  ;;  %v386_v51 = vld [vmem:[#allocation10 + $0x30] sm:$0xff]  ;;  %v693_v53 = vpack.c.bf16 %v155_v47, %v153_v46 }
  0x76   :  { %728 = vmatprep.subr.bf16.mxu1 %v727_v3  ;;  %v387_v52 = vld [vmem:[#allocation10 + $0x38] sm:$0xff]  ;;  %v695_v54 = vpack.c.bf16 %v160_v49, %v158_v48  ;;  %v157_v55 = vld [vmem:[#allocation7 + $0x1a0] sm:$0xff]  ;;  %v159_v56 = vld [vmem:[#allocation7 + $0x1b0] sm:$0xff] }
  0x77   :  { %670 = vmatpush1.bf16.msra.mxu0 %v669_v60  ;;  %v162_v57 = vld [vmem:[#allocation7 + $0x1c8] sm:$0xff]  ;;  %v164_v58 = vld [vmem:[#allocation7 + $0x1d8] sm:$0xff]  ;;  %v751_v59 = vpack.c.bf16 %v387_v52, %v386_v51  ;;  %v388_v60 = vld [vmem:[#allocation10 + $0x40] sm:$0xff]  ;;  %v697_v62 = vpack.c.bf16 %v159_v56, %v157_v55 }
  0x78   :  { %672 = vmatprep.subr.bf16.mxu0 %v671_v61  ;;  %v389_v61 = vld [vmem:[#allocation10 + $0x48] sm:$0xff]  ;;  %v699_v63 = vpack.c.bf16 %v164_v58, %v162_v57  ;;  %v161_v1 = vld [vmem:[#allocation7 + $0x1c0] sm:$0xff]  ;;  %v163_v2 = vld [vmem:[#allocation7 + $0x1d0] sm:$0xff] }
  0x79   :  { %730 = vmatpush3.bf16.msra.mxu1 %v727_v3  ;;  %v166_v3 = vld [vmem:[#allocation7 + $0x1e8] sm:$0xff]  ;;  %v168_v4 = vld [vmem:[#allocation7 + $0x1f8] sm:$0xff]  ;;  %v755_v5 = vpack.c.bf16 %v389_v61, %v388_v60  ;;  %v701_v9 = vpack.c.bf16 %v163_v2, %v161_v1  ;;  %v165_v11 = vld [vmem:[#allocation7 + $0x1e0] sm:$0xff] }
  0x7a   :  { %732 = vmatprep.subr.bf16.mxu1 %v731_v13  ;;  %v703_v10 = vpack.c.bf16 %v168_v4, %v166_v3  ;;  %v167_v12 = vld [vmem:[#allocation7 + $0x1f0] sm:$0xff]  ;;  %v392_v14 = vld [vmem:[#allocation10 + $0x60] sm:$0xff]  ;;  %v393_v15 = vld [vmem:[#allocation10 + $0x68] sm:$0xff] }
  0x7b   :  { %674 = vmatpush1.bf16.msra.mxu0 %v673_v6  ;;  %v390_v6 = vld [vmem:[#allocation10 + $0x50] sm:$0xff]  ;;  %v395_v19 = vld [vmem:[#allocation10 + $0x78] sm:$0xff]  ;;  %v169_v27 = vld [vmem:[%s1182_s5] sm:$0x3] }
  0x7c   :  { %676 = vmatprep.subr.bf16.mxu0 %v675_v8  ;;  %v391_v8 = vld [vmem:[#allocation10 + $0x58] sm:$0xff]  ;;  %v394_v18 = vld [vmem:[#allocation10 + $0x70] sm:$0xff]  ;;  %v536_v48 = vld [vmem:[%s1184_s7] ss:$0 sm:$0xff] }
  0x7d   :  { %734 = vmatpush3.bf16.msra.mxu1 %v731_v13  ;;  %v759_v13 = vpack.c.bf16 %v391_v8, %v390_v6  ;;  %v1123_v20 = vld [vmem:[#allocation5 + $0x8] sm:$0xff]  ;;  %v767_v21 = vpack.c.bf16 %v395_v19, %v394_v18 }
  0x7e   :  { %736 = vmatprep.subr.bf16.mxu1 %v735_v22 }
  0x7f   :  { %678 = vmatpush1.bf16.msra.mxu0 %v677_v16  ;;  %v705_v16 = vpack.c.bf16 %v167_v12, %v165_v11 }
  0x80   :  { %680 = vmatprep.subr.bf16.mxu0 %v679_v17  ;;  %v763_v17 = vpack.c.bf16 %v393_v15, %v392_v14 }
  0x81   :  { %738 = vmatpush3.bf16.msra.mxu1 %v735_v22 }
  0x82   :  { %740 = vmatprep.subr.bf16.mxu1 %v739_v31 }
  0x83   :  { %682 = vmatpush1.bf16.msra.mxu0 %v681_v25  ;;  %v172_v25 = vshrl.u32 %v171_v24, 7 }
  0x84   :  { %684 = vmatprep.subr.bf16.mxu0 %v683_v26  ;;  %606 = vmatmul.mubr.f32.vlgmr.msra.gmra.mrb[0].mxu1 %v1119_v38 }
  0x85   :  { %742 = vmatpush3.bf16.msra.mxu1 %v739_v31  ;;  %640 = vmatprep.mubr.f32.mxu1 %v1116_v7  ;;  %v173_v26 = vsub.s32 0, %v172_v25  ;;  %v177_v30 = vsub.s32 1, %v172_v25 }
  0x86   :  { %744 = vmatprep.subr.bf16.mxu1 %v743_v41 }
  0x87   :  { %686 = vmatpush1.bf16.msra.mxu0 %v685_v34  ;;  %v174_v28 = vrot.slane %v169_v27, %v173_v26  ;;  %v178_v34 = vrot.slane %v169_v27, %v177_v30 }
  0x88   :  { %688 = vmatprep.subr.bf16.mxu0 %v687_v35 }
  0x89   :  { %746 = vmatpush3.bf16.msra.mxu1 %v743_v41 }
  0x8a   :  { %748 = vmatprep.subr.bf16.mxu1 %v747_v50 }
  0x8b   :  { %690 = vmatpush1.bf16.msra.mxu0 %v689_v44 }
  0x8c   :  { %692 = vmatprep.subr.bf16.mxu0 %v691_v45 }
  0x8d   :  { %750 = vmatpush3.bf16.msra.mxu1 %v747_v50  ;;  %v535_v50 = vld [vmem:[%s1183_s6] ss:$0 sm:$0xff]  ;;  %s975_s6 = smov [#allocation11]  }
  0x8e   :  { %752 = vmatprep.subr.bf16.mxu1 %v751_v59  ;;  %s501_s7 = sshll.u32 %s975_s6, 4  ;;  %s502_s7 = int_to_ptr.vmem [resolvable:$true] %s501_s7 }
  0x8f   :  { %694 = vmatpush1.bf16.msra.mxu0 %v693_v53  ;;  %s912_s14 = scalar_lea.vmem %s502_s7, 256  ;;  %p917_p13 = scmp.lt.s32.totalorder %s502_s7, %s502_s7 }
  0x90   :  { %696 = vmatprep.subr.bf16.mxu0 %v695_v54  ;;  %p913_p12 = scmp.ne.s32.totalorder %s502_s7, %s912_s14  ;;  %p918_p0 = scmp.lt.s32.totalorder %s912_s14, %s912_s14 }
  0x91   :  { %754 = vmatpush3.bf16.msra.mxu1 %v751_v59 }
  0x92   :  { %756 = vmatprep.subr.bf16.mxu1 %v755_v5  ;;  %p919_p1 = por %p918_p0, %p917_p13 }
  0x93   :  { %698 = vmatpush1.bf16.msra.mxu0 %v697_v62 }
  0x94   :  { %700 = vmatprep.subr.bf16.mxu0 %v699_v63  ;;  %p920_p2 = pnand %p919_p1, %p913_p12 }
  0x95   :  { %758 = vmatpush3.bf16.msra.mxu1 %v755_v5 }
  0x96   :  { %760 = vmatprep.subr.bf16.mxu1 %v759_v13 }
  0x97   :  { %702 = vmatpush1.bf16.msra.mxu0 %v701_v9 }
  0x98   :  { %704 = vmatprep.subr.bf16.mxu0 %v703_v10 }
  0x99   :  { %762 = vmatpush3.bf16.msra.mxu1 %v759_v13 }
  0x9a   :  { %764 = vmatprep.subr.bf16.mxu1 %v763_v17 }
  0x9b   :  { %706 = vmatpush1.bf16.msra.mxu0 %v705_v16 }
  0x9d   :  { %766 = vmatpush3.bf16.msra.mxu1 %v763_v17 }
  0x9e   :  { %246 = vmatmul.mubr.f32.vlgmr.msra.gmra.mrb[0].mxu0 %v1113_v0  ;;  %768 = vmatprep.subr.bf16.mxu1 %v767_v21 }
  0x9f   :  { %251 = vmatprep.mubr.f32.mxu0 %v1123_v20 }
  0xa1   :  { %770 = vmatpush3.bf16.msra.mxu1 %v767_v21 }
  0xa2   :  { %252 = vmatmul.mubr.f32.gmra.mrb[2].mxu0 %v1119_v38 }
  0xa4   :  { %641 = vmatmul.mubr.f32.vlgmr.msra.gmra.mrb[2].mxu1 %v1123_v20 }
 0x157   :  { %v607_v22 = vpop.f32.mrb[0].mxu1 }
 0x158   :  { %v371_v23 = vpop.f32.mrb[1].mxu1  ;;  %v377_v60 = vadd.f32 %v607_v22, %v535_v50 }
 0x159   :  { %v372_v53 = vadd.f32 %v535_v50, %v371_v23 }
 0x171   :  { %v247_v0 = vpop.f32.mrb[0].mxu0 }
 0x172   :  { %v248_v29 = vadd.f32 %v247_v0, %v174_v28  ;;  %v249_v31 = vpop.f32.mrb[1].mxu0 }
 0x173   :  { %v250_v38 = vadd.f32 %v249_v31, %v178_v34 }
 0x174   :  { %v531_v32 = vmul.f32 -1.442695, %v248_v29 }
 0x175   :  { %v253_v33 = vpop.f32.mrb[2].mxu0  ;;  %v532_v41 = vmul.f32 -1.442695, %v250_v38 }
 0x176   :  { %782 = vpow2.f32 %v531_v32  ;;  %v254_v35 = vadd.f32 %v253_v33, %v174_v28  ;;  %v255_v36 = vpop.f32.mrb[3].mxu0 }
 0x177   :  { %v642_v39 = vpop.f32.mrb[2].mxu1  ;;  %v256_v42 = vadd.f32 %v255_v36, %v178_v34 }
 0x178   :  { %v533_v37 = vmul.f32 -1.442695, %v254_v35  ;;  %v469_v40 = vpop.f32.mrb[3].mxu1  ;;  %v475_v54 = vadd.f32 %v642_v39, %v536_v48 }
 0x179   :  { %v534_v45 = vmul.f32 -1.442695, %v256_v42  ;;  %v470_v49 = vadd.f32 %v536_v48, %v469_v40 }
 0x17a   :  { %784 = vpow2.f32 %v533_v37 }
 0x17b   :  { %786 = vpow2.f32 %v532_v41 }
 0x180   :  { %v783_v43 = vpop.eup %782 }
 0x181   :  { %v270_v44 = vadd.f32 1.0, %v783_v43 }
 0x183   :  { %788 = vrcp.f32 %v270_v44 }
 0x184   :  { %v785_v46 = vpop.eup %784  ;;  %790 = vpow2.f32 %v534_v45 }
 0x185   :  { %v272_v47 = vadd.f32 1.0, %v785_v46  ;;  %v787_v51 = vpop.eup %786 }
 0x186   :  { %v271_v57 = vadd.f32 1.0, %v787_v51 }
 0x187   :  { %792 = vrcp.f32 %v272_v47 }
 0x18d   :  { %v789_v52 = vpop.eup %788 }
 0x18e   :  { %v478_v55 = vmul.f32 %v789_v52, %v470_v49  ;;  %v791_v56 = vpop.eup %790 }
 0x18f   :  { %v273_v62 = vadd.f32 1.0, %v791_v56 }
 0x190   :  { %v480_v58 = vadd.f32 %v478_v55, %v372_v53 }
 0x191   :  { %v793_v59 = vpop.eup %792 }
 0x192   :  { %v479_v61 = vmul.f32 %v793_v59, %v475_v54  ;;  %794 = vtanh.f32 %v480_v58 }
 0x193   :  { %796 = vrcp.f32 %v271_v57 }
 0x194   :  { %v481_v63 = vadd.f32 %v479_v61, %v377_v60 }
 0x196   :  { %798 = vtanh.f32 %v481_v63 }
 0x197   :  { %800 = vrcp.f32 %v273_v62 }
 0x19c   :  { %v795_v1 = vpop.eup %794 }
 0x19d   :  { %v484_v2 = vsub.f32 %v1116_v7, %v795_v1  ;;  %v797_v3 = vpop.eup %796 }
 0x19f   :  { %v486_v4 = vmul.f32 %v797_v3, %v484_v2 }
 0x1a0   :  { %v799_v5 = vpop.eup %798 }
 0x1a1   :  { %v485_v6 = vsub.f32 %v1123_v20, %v799_v5  ;;  %v488_v8 = vadd.f32 %v795_v1, %v486_v4  ;;  %v801_v9 = vpop.eup %800 }
 0x1a3   :  { %v487_v10 = vmul.f32 %v801_v9, %v485_v6  ;;  %490 = vst [vmem:[#allocation11] sm:$0xff] %v488_v8  ;;  %v492_v11 = vmax.f32 %v488_v8, 0.0 }
 0x1a5   :  { %v489_v12 = vadd.f32 %v799_v5, %v487_v10  ;;  %494 = vst [vmem:[#allocation12] sm:$0xff] %v492_v11 }
 0x1a7   :  { %491 = vst [vmem:[#allocation11 + $0x8] sm:$0xff] %v489_v12  ;;  %v493_v13 = vmax.f32 %v489_v12, 0.0 }
 0x1a8   :  { %923 = shalt.err (!%p920_p2)
}
 0x1a9   :  { %s924_s16 = scalar_lea.hbm %s1185_s8, 256 }
 0x1aa   :  { %p925_p3 = scmp.ne.s32.totalorder %s1185_s8, %s924_s16  ;;  %p928_p4 = scmp.lt.u32.totalorder %s924_s16, %s1185_s8 }
 0x1ac   :  { %p930_p5 = pnand %p928_p4, %p925_p3 }
 0x1ae   :  { %933 = shalt.err (!%p930_p5)
}
 0x1af   :  { %507 = dma.vmem_to_hbm [thread:$0]  %s502_s7, 256, %s1185_s8, [#allocation4], %s968_s21, %s968_s21, %s969_s22   ;;  %495 = vst [vmem:[#allocation12 + $0x8] sm:$0xff] %v493_v13 }
 0x1b0   :  { %s934_s26 = scalar_lea.vmem %s1140_s10, 256  ;;  %p939_p7 = scmp.lt.s32.totalorder %s1140_s10, %s1140_s10 }
 0x1b1   :  { %p935_p6 = scmp.ne.s32.totalorder %s1140_s10, %s934_s26  ;;  %p940_p8 = scmp.lt.s32.totalorder %s934_s26, %s934_s26 }
 0x1b3   :  { %p941_p9 = por %p940_p8, %p939_p7 }
 0x1b5   :  { %p942_p10 = pnand %p941_p9, %p935_p6 }
 0x1b7   :  { %945 = shalt.err (!%p942_p10)
}
 0x1b8   :  { %s946_s27 = scalar_lea.hbm %s1186_s9, 256 }
 0x1b9   :  { %p947_p11 = scmp.ne.s32.totalorder %s1186_s9, %s946_s27  ;;  %p950_p12 = scmp.lt.u32.totalorder %s946_s27, %s1186_s9 }
 0x1bb   :  { %p952_p13 = pnand %p950_p12, %p947_p11 }
 0x1bd   :  { %955 = shalt.err (!%p952_p13)
}
 0x1be   :  { %519 = dma.vmem_to_hbm [thread:$0]  %s1140_s10, 256, %s1186_s9, [#allocation13], %s968_s21, %s968_s21, %s969_s22  }
 0x1bf   :  { %962 = dma.done.wait [#allocation4], 256  }
 0x1c0   :  { %963 = vsyncadd [#allocation4], 4294967040 }
 0x1c1   :  { %964 = dma.done.wait [#allocation13], 256  }
 0x1c2   :  { %965 = vsyncadd [#allocation13], 4294967040 }
 0x1c3   :  { %526 = vsyncpa [#allocation3], 1 }
 0x1c4   :  { %527 = vsyncpa [#allocation6], 1 }
 0x1c5   :  { %528 = vsyncpa [#allocation9], 1 }
 0x1c6   :  { %529 = vsyncpa [#allocation4], 1 }
 0x1c7   :  { %530 = vsyncpa [#allocation13], 1 }

</bundles_post_ra>
